<compile_context>
chip_gen: v5e
topology: v5e:2x2
jax: 0.10.0
libtpu: 0.0.40
codegen_flags: <defaults>
</compile_context>

<pallas_src>
import functools
import math

import jax
import jax.numpy as jnp
import numpy as np
from jax import lax
from jax.experimental import pallas as pl
from jax.experimental.pallas import tpu as pltpu

_VMEM_LIMIT = 64 * 1024 * 1024  # explicit scoped-VMEM budget; safe on v5e/v6e/v7x


# ---------------------------------------------------------------------------
# Helpers
# ---------------------------------------------------------------------------
def _pick_tile(dim: int, target: int, align: int) -> int:
    """Largest multiple of `align` that divides `dim` and is <= `target`.

    Falls back to the full dimension (full-extent blocks are exempt from the
    (8,128) divisibility rule)."""
    if dim <= target:
        return dim
    start = (target // align) * align
    for cand in range(start, 0, -align):
        if dim % cand == 0:
            return cand
    return dim


def _half_split_permutation(num_heads: int, head_dim: int) -> jnp.ndarray:
    """Per-head feature permutation interleaved -> half-split: [0,2,..,E-2,1,3,..,E-1]."""
    e = np.arange(head_dim)
    within = np.concatenate([e[0::2], e[1::2]])
    perm = np.concatenate([h * head_dim + within for h in range(num_heads)])
    return jnp.asarray(perm, dtype=jnp.int32)


def _rope_table_packed(seq_len: int, head_dim: int, base: float = 10000.0):
    """Packed RoPE table (S, E): cos in lanes [0, E/2), sin in lanes [E/2, E)."""
    t = jnp.arange(seq_len, dtype=jnp.float32)
    exponent = jnp.arange(0, head_dim, 2, dtype=jnp.float32) / head_dim
    theta = 1.0 / jnp.power(base, exponent)          # (E//2,)
    ang = t[:, None] * theta[None, :]                # (S, E//2)
    return jnp.concatenate([jnp.cos(ang), jnp.sin(ang)], axis=-1)   # (S, E)


def _rope_half(x1, x2, cos, sin):
    """Half-split RoPE rotation (pure VPU work)."""
    return jnp.concatenate([x1 * cos - x2 * sin, x2 * cos + x1 * sin], axis=-1)


# ---------------------------------------------------------------------------
# Grouped / tiled linear projection:  y[g] = x @ w[g]^T   (bias-free nn.Linear)
# ---------------------------------------------------------------------------
def _linear_kernel(x_ref, w_ref, o_ref, acc_ref):
    @pl.when(pl.program_id(3) == 0)
    def _():
        acc_ref[...] = jnp.zeros_like(acc_ref)

    # Contract on the last axis of both operands -> no wrapper-side w transpose.
    acc_ref[...] += lax.dot_general(
        x_ref[...], w_ref[0], (((1,), (1,)), ((), ())),
        preferred_element_type=jnp.float32)

    @pl.when(pl.program_id(3) == pl.num_programs(3) - 1)
    def _():
        o_ref[0] = acc_ref[...].astype(o_ref.dtype)


def _grouped_linear(x2d, w3d, *, out_dtype, tm=256, tn=256, tk=512):
    M, K = x2d.shape
    G, N, K2 = w3d.shape
    assert K == K2
    tm = _pick_tile(M, tm, 16)
    tn = _pick_tile(N, tn, 128)
    tk = _pick_tile(K, tk, 128)
    isz_in = jnp.dtype(x2d.dtype).itemsize
    isz_out = jnp.dtype(out_dtype).itemsize
    cost = pl.CostEstimate(
        flops=int(2 * G * M * N * K),
        transcendentals=0,
        bytes_accessed=int(isz_in * (M * K + G * N * K) + isz_out * G * M * N))
    return pl.pallas_call(
        _linear_kernel,
        out_shape=jax.ShapeDtypeStruct((G, M, N), out_dtype),
        grid=(G, M // tm, N // tn, K // tk),
        in_specs=[
            pl.BlockSpec((tm, tk), lambda g, i, j, k: (i, k)),
            pl.BlockSpec((1, tn, tk), lambda g, i, j, k: (g, j, k)),
        ],
        out_specs=pl.BlockSpec((1, tm, tn), lambda g, i, j, k: (g, i, j)),
        scratch_shapes=[pltpu.VMEM((tm, tn), jnp.float32)],
        compiler_params=pltpu.CompilerParams(
            dimension_semantics=("parallel", "parallel", "parallel", "arbitrary"),
            vmem_limit_bytes=_VMEM_LIMIT),
        cost_estimate=cost,
    )(x2d, w3d)


# ---------------------------------------------------------------------------
# K-side RoPE pre-pass (one read + one write of the K slab)
# ---------------------------------------------------------------------------
def _rope_k_kernel(k_ref, cs_ref, o_ref, *, num_heads):
    # k_ref: (1, 1, ts, D) half-split K tile; cs_ref: (ts, E) packed [cos|sin]
    D = k_ref.shape[3]
    E = D // num_heads
    E2 = E // 2
    k = k_ref[0, 0].astype(jnp.float32)
    cos = cs_ref[:, :E2]
    sin = cs_ref[:, E2:]
    rows = []
    for h in range(num_heads):
        lo = h * E
        rows.append(_rope_half(k[:, lo:lo + E2], k[:, lo + E2:lo + E], cos, sin))
    o_ref[0] = jnp.concatenate(rows, axis=-1).astype(o_ref.dtype)


def _rope_keys(qkv, cs, *, num_heads, out_dtype, seq_tile=256):
    _, B, S, D = qkv.shape
    E = D // num_heads
    ts = _pick_tile(S, seq_tile, 16)
    isz = jnp.dtype(out_dtype).itemsize
    cost = pl.CostEstimate(
        flops=int(6 * B * S * D), transcendentals=0,
        bytes_accessed=int(2 * isz * B * S * D + 4 * S * E))
    kernel = functools.partial(_rope_k_kernel, num_heads=num_heads)
    return pl.pallas_call(
        kernel,
        out_shape=jax.ShapeDtypeStruct((B, S, D), out_dtype),
        grid=(B, S // ts),
        in_specs=[
            pl.BlockSpec((1, 1, ts, D), lambda b, si: (1, b, si, 0)),   # K slab of qkv
            pl.BlockSpec((ts, E), lambda b, si: (si, 0)),
        ],
        out_specs=pl.BlockSpec((1, ts, D), lambda b, si: (b, si, 0)),
        compiler_params=pltpu.CompilerParams(
            dimension_semantics=("parallel", "parallel"),
            vmem_limit_bytes=_VMEM_LIMIT),
        cost_estimate=cost,
    )(qkv, cs)


# ---------------------------------------------------------------------------
# Fused flash attention kernel (all heads per step, lane-dense scratch/output)
# ---------------------------------------------------------------------------
def _attn_kernel(q_ref, k_ref, v_ref, cs_ref, *rest, num_heads, causal, scale,
                 mxu_dtype):
    # q_ref:    (1, 1, TQ, D)  q tile (half-split per-head layout, NOT yet roped)
    # k_ref:    (1, TK, D)     key tile (already roped by the pre-pass)
    # v_ref:    (1, 1, TK, D)  value tile (original layout)
    # cs_ref:   (TQ, E) packed [cos|sin] table for the q rows (f32)
    # mask_ref: (TQ, TK) additive mask (only when causal=False)
    # o_ref:    (1, TQ, D) lane-dense output block (heads concatenated)
    # q_sc:     (TQ, D)  roped + scaled q, mxu_dtype   (persists across kv steps)
    # m_sc/l_sc:(TQ, H)  online-softmax max / denominator (f32)
    # acc_sc:   (TQ, D)  f32 context accumulator, head h in lanes [h*E,(h+1)*E)
    if causal:
        o_ref, q_sc, m_sc, l_sc, acc_sc = rest
        mask_ref = None
    else:
        mask_ref, o_ref, q_sc, m_sc, l_sc, acc_sc = rest

    qi = pl.program_id(1)
    kv = pl.program_id(2)
    H = num_heads
    D = q_ref.shape[3]
    E = D // H
    E2 = E // 2
    TQ = q_ref.shape[2]
    TK = k_ref.shape[1]

    @pl.when(kv == 0)
    def _():
        m_sc[...] = jnp.full_like(m_sc, -jnp.inf)
        l_sc[...] = jnp.zeros_like(l_sc)
        acc_sc[...] = jnp.zeros_like(acc_sc)
        # Hoisted q-side RoPE: done ONCE per q tile, with 1/sqrt(E) folded into
        # the cos/sin so no per-step scaling is needed.
        q = q_ref[0, 0].astype(jnp.float32)
        cos = cs_ref[:, :E2] * scale
        sin = cs_ref[:, E2:] * scale
        rows = []
        for h in range(H):
            lo = h * E
            rows.append(_rope_half(q[:, lo:lo + E2], q[:, lo + E2:lo + E], cos, sin))
        q_sc[...] = jnp.concatenate(rows, axis=-1).astype(q_sc.dtype)

    def _step():
        k = k_ref[0]
        v = v_ref[0, 0]
        if causal:
            # Generate the additive causal mask in-kernel: no mask HBM traffic.
            row = qi * TQ + lax.broadcasted_iota(jnp.int32, (TQ, TK), 0)
            col = kv * TK + lax.broadcasted_iota(jnp.int32, (TQ, TK), 1)
            mask = jnp.where(col <= row, 0.0, -1e9)
        else:
            mask = mask_ref[...].astype(jnp.float32)

        # TODO(synk): for very large H (>=16) switch this static unroll to a
        # lax.fori_loop with dynamic lane slices to bound vreg live ranges.
        for h in range(H):
            lo = h * E
            q_h = q_sc[:, lo:lo + E].astype(mxu_dtype)   # roped + scaled already
            k_h = k[:, lo:lo + E].astype(mxu_dtype)
            # (TQ, TK) scores: contract last axis of both (no k.T relayout).
            s = lax.dot_general(q_h, k_h, (((1,), (1,)), ((), ())),
                                preferred_element_type=jnp.float32)
            s = s + mask
            m_prev = m_sc[:, h:h + 1]
            m_new = jnp.maximum(m_prev, jnp.max(s, axis=-1, keepdims=True))
            alpha = jnp.exp(m_prev - m_new)
            p = jnp.exp(s - m_new)
            l_sc[:, h:h + 1] = alpha * l_sc[:, h:h + 1] + jnp.sum(
                p, axis=-1, keepdims=True)
            acc_sc[:, lo:lo + E] = alpha * acc_sc[:, lo:lo + E] + jnp.dot(
                p.astype(mxu_dtype), v[:, lo:lo + E].astype(mxu_dtype),
                preferred_element_type=jnp.float32)
            m_sc[:, h:h + 1] = m_new

    if causal:
        # Skip fully-masked (qi, kv) tiles entirely (~2x fewer cycles for causal).
        pl.when(kv * TK < (qi + 1) * TQ)(_step)
    else:
        _step()

    @pl.when(kv == pl.num_programs(2) - 1)
    def _():
        inv = pl.reciprocal(l_sc[...], approx=True)          # (TQ, H)
        inv_full = jnp.concatenate(
            [jnp.broadcast_to(inv[:, h:h + 1], (TQ, E)) for h in range(H)], axis=-1)
        o_ref[0] = (acc_sc[...] * inv_full).astype(o_ref.dtype)   # lane-dense store


# ---------------------------------------------------------------------------
# Wrapper
# ---------------------------------------------------------------------------
def attention_forward(x, mask_bool, w1, w2, num_heads, *, causal=False,
                      q_tile=256, kv_tile=512, mxu_dtype=jnp.bfloat16):
    """Pallas implementation of Attention.forward.

    x:         (B, S, D) float32
    mask_bool: boolean, broadcastable to (S, S); True = attend (shared across
               batch & heads). Ignored when causal=True (mask generated in-kernel).
    w1:        (3D, D)  weights of linear_1 (y = x @ w1.T, bias-free)
    w2:        (D, D)   weights of linear_2
    causal:    if True, use the in-kernel causal mask + dead-tile skipping.
    mxu_dtype: MXU operand / intermediate storage dtype (bf16 default on all
               generations); softmax statistics, mask-add and accumulation are f32.
    """
    B, S, D = x.shape
    H = num_heads
    assert D % H == 0, "embedding dimension must be divisible by number_of_heads"
    E = D // H
    assert E % 2 == 0, "RoPE needs an even head dimension"
    use_f32 = jnp.dtype(mxu_dtype) == jnp.dtype(jnp.float32)

    # One-time weight-side reshuffle (no activation data movement): permute the
    # q/k rows of linear_1 from interleaved-pair order to half-split order so
    # in-kernel RoPE is slice/mul/concat instead of a matmul with a P matrix.
    perm = _half_split_permutation(H, E)
    w1_r = w1.reshape(3, D, D)
    w_qkv = jnp.stack([w1_r[0][perm], w1_r[1][perm], w1_r[2]], axis=0)   # (3, D, D)
    w_qkv = w_qkv.astype(mxu_dtype)
    x_c = x.astype(mxu_dtype)

    # Fused QKV projection: one grouped matmul -> (3, B*S, D), stored in mxu_dtype.
    qkv = _grouped_linear(x_c.reshape(B * S, D), w_qkv, out_dtype=mxu_dtype)
    qkv = qkv.reshape(3, B, S, D)

    # Packed RoPE table (S, E): cos | sin, shared by every head.
    cs = _rope_table_packed(S, E)

    # Pre-apply RoPE to K (one cheap elementwise pass) so the attention kernel
    # never recomputes it per q tile.
    k_roped = _rope_keys(qkv, cs, num_heads=H, out_dtype=mxu_dtype)

    tq = _pick_tile(S, q_tile, 16)
    tkv = _pick_tile(S, kv_tile, 16)
    n_q, n_kv = S // tq, S // tkv
    scale = 1.0 / math.sqrt(E)

    kernel = functools.partial(
        _attn_kernel, num_heads=H, causal=causal, scale=scale, mxu_dtype=mxu_dtype)

    in_specs = [
        pl.BlockSpec((1, 1, tq, D), lambda b, qi, kv: (0, b, qi, 0)),   # q (from qkv)
        pl.BlockSpec((1, tkv, D), lambda b, qi, kv: (b, kv, 0)),        # roped k
        pl.BlockSpec((1, 1, tkv, D), lambda b, qi, kv: (2, b, kv, 0)),  # v (from qkv)
        pl.BlockSpec((tq, E), lambda b, qi, kv: (qi, 0)),               # cos|sin (q rows)
    ]
    operands = [qkv, k_roped, qkv, cs]

    if not causal:
        # Compact additive (S, S) mask shared across batch & heads.
        # TODO(synk): per-(batch, head) masks would need a batch-indexed mask BlockSpec.
        mask_arr = jnp.asarray(mask_bool)
        if mask_arr.ndim > 2:
            assert all(d == 1 for d in mask_arr.shape[:-2]), (
                "this kernel assumes the mask is shared across batch and heads")
            mask_arr = mask_arr.reshape(mask_arr.shape[-2:])
        mask_arr = jnp.broadcast_to(mask_arr, (S, S))
        mask_dtype = jnp.float32 if use_f32 else jnp.bfloat16
        mask_add = jnp.where(mask_arr, 0.0, -1e9).astype(mask_dtype)
        in_specs.append(pl.BlockSpec((tq, tkv), lambda b, qi, kv: (qi, kv)))
        operands.append(mask_add)

    isz = jnp.dtype(mxu_dtype).itemsize
    attn_cost = pl.CostEstimate(
        flops=int(4 * B * S * S * D),
        transcendentals=int(B * H * S * S),
        bytes_accessed=int(isz * B * S * D * (2 + 2 * n_q) + 4 * S * E))

    ctx = pl.pallas_call(
        kernel,
        out_shape=jax.ShapeDtypeStruct((B, S, D), mxu_dtype),
        grid=(B, n_q, n_kv),
        in_specs=in_specs,
        out_specs=pl.BlockSpec((1, tq, D), lambda b, qi, kv: (b, qi, 0)),
        scratch_shapes=[
            pltpu.VMEM((tq, D), mxu_dtype),     # hoisted roped+scaled q
            pltpu.VMEM((tq, H), jnp.float32),   # running row max (per head)
            pltpu.VMEM((tq, H), jnp.float32),   # running softmax denominator
            pltpu.VMEM((tq, D), jnp.float32),   # lane-dense context accumulator
        ],
        compiler_params=pltpu.CompilerParams(
            dimension_semantics=("parallel", "parallel", "arbitrary"),
            vmem_limit_bytes=_VMEM_LIMIT),
        cost_estimate=attn_cost,
    )(*operands)

    # Output projection; ctx is already (B, S, D) so no merge transpose is needed.
    out = _grouped_linear(ctx.reshape(B * S, D),
                          w2.reshape(1, D, D).astype(mxu_dtype),
                          out_dtype=x.dtype)
    return out.reshape(B, S, D)


# ---------------------------------------------------------------------------
# Pure-JAX reference (mirrors the PyTorch module exactly)
# ---------------------------------------------------------------------------
def attention_reference(x, mask_bool, w1, w2, num_heads):
    B, S, D = x.shape
    H = num_heads
    E = D // H
    qkv = (x @ w1.T).reshape(B, S, 3, H, E)
    q = jnp.transpose(qkv[:, :, 0], (0, 2, 1, 3))
    k = jnp.transpose(qkv[:, :, 1], (0, 2, 1, 3))
    v = jnp.transpose(qkv[:, :, 2], (0, 2, 1, 3))

    t = jnp.arange(S, dtype=jnp.float32)
    exponent = jnp.arange(0, E, 2, dtype=jnp.float32) / E
    theta = 1.0 / jnp.power(10000.0, exponent)
    enc = jnp.repeat(t[:, None] * theta[None, :], 2, axis=-1)     # interleaved (S, E)
    cos, sin = jnp.cos(enc), jnp.sin(enc)

    def rotate_half(t_):
        x1 = t_[..., 0::2]
        x2 = t_[..., 1::2]
        return jnp.stack((-x2, x1), axis=-1).reshape(t_.shape)

    q = q * cos + rotate_half(q) * sin
    k = k * cos + rotate_half(k) * sin

    scale = 1.0 / math.sqrt(E)
    scores = jnp.einsum("bhse,bhte->bhst", q, k) * scale
    scores = scores + jnp.where(jnp.broadcast_to(mask_bool, scores.shape), 0.0, -1e9)
    p = jax.nn.softmax(scores, axis=-1)
    ctx = jnp.einsum("bhst,bhte->bhse", p, v)
    merged = jnp.transpose(ctx, (0, 2, 1, 3)).reshape(B, S, D)
    return merged @ w2.T


# ---------------------------------------------------------------------------
if __name__ == "__main__":
    B, S, D, H = 2, 8, 32, 4  # embedding_dimension=32, number_of_heads=4

    key = jax.random.PRNGKey(0)
    kx, kw1, kw2 = jax.random.split(key, 3)

    x = jax.random.normal(kx, (B, S, D), dtype=jnp.float32)
    # nn.Linear weights: (out_features, in_features), bias=False
    w1 = jax.random.normal(kw1, (3 * D, D), dtype=jnp.float32) * (1.0 / math.sqrt(D))
    w2 = jax.random.normal(kw2, (D, D), dtype=jnp.float32) * (1.0 / math.sqrt(D))

    # Boolean attention mask (True = attend), causal, broadcast over batch/head.
    mask = jnp.tril(jnp.ones((S, S), dtype=bool))[None, None]       # (1, 1, S, S)

    ref = attention_reference(x, mask, w1, w2, H)

    # f32 MXU operands + explicit DMA'd mask: strict-ish tolerance (the approx
    # EUP reciprocal in the softmax epilogue has ~1e-4 relative error).
    out_f32 = jax.block_until_ready(
        attention_forward(x, mask, w1, w2, H, causal=False, mxu_dtype=jnp.float32))
    np.testing.assert_allclose(np.asarray(out_f32), np.asarray(ref),
                               rtol=5e-3, atol=5e-3)

    # Default path: bf16 MXU operands / bf16 intermediates, in-kernel causal
    # mask generation + dead-tile skipping. f32 accumulation throughout, so the
    # only extra error is bf16 operand rounding -> loose tolerance.
    out_bf16 = jax.block_until_ready(
        attention_forward(x, mask, w1, w2, H, causal=True))
    np.testing.assert_allclose(np.asarray(out_bf16), np.asarray(ref),
                               rtol=1e-1, atol=1e-1)

    print("KERNEL_OK")
</pallas_src>

<mosaic_0001>
module attributes {stable_mosaic.version = 11 : i64} {
  func.func @_linear_kernel(%arg0: i32, %arg1: i32, %arg2: i32, %arg3: i32, %arg4: memref<16x32xf32, #tpu.memory_space<vmem>>, %arg5: memref<1x32x32xf32, #tpu.memory_space<vmem>>, %arg6: memref<1x16x32xf32, #tpu.memory_space<vmem>>, %arg7: memref<16x32xf32, #tpu.memory_space<vmem>>) attributes {dimension_semantics = [#tpu.dimension_semantics<parallel>, #tpu.dimension_semantics<parallel>, #tpu.dimension_semantics<parallel>, #tpu.dimension_semantics<arbitrary>], iteration_bounds = array<i64: 3, 1, 1, 1>, scalar_prefetch = 0 : i64, scratch_operands = 1 : i64, tpu.core_type = #tpu.core_type<tc>, window_params = [{transform_indices = @transform_0, window_bounds = array<i64: 16, 32>}, {transform_indices = @transform_1, window_bounds = array<i64: 1, 32, 32>}, {transform_indices = @transform_2, window_bounds = array<i64: 1, 16, 32>}]} {
    %c0_i32 = arith.constant 0 : i32
    %0 = arith.cmpi eq, %arg3, %c0_i32 : i32
    %1 = arith.extui %0 : i1 to i32
    %c0_i32_0 = arith.constant 0 : i32
    %2 = arith.cmpi ne, %1, %c0_i32_0 : i32
    scf.if %2 {
      %cst_11 = arith.constant 0.000000e+00 : f32
      %13 = vector.broadcast %cst_11 : f32 to vector<16x32xf32>
      %c0_12 = arith.constant 0 : index
      %c0_13 = arith.constant 0 : index
      %14 = vector.load %arg7[%c0_12, %c0_13] : memref<16x32xf32, #tpu.memory_space<vmem>>, vector<16x32xf32>
      tpu.vector_store %arg7[%c0_12, %c0_13], %13 {strides = array<i32>} : memref<16x32xf32, #tpu.memory_space<vmem>>, vector<16x32xf32>,
    } else {
    }
    %c0 = arith.constant 0 : index
    %c0_1 = arith.constant 0 : index
    %3 = vector.load %arg7[%c0, %c0_1] : memref<16x32xf32, #tpu.memory_space<vmem>>, vector<16x32xf32>
    %c0_2 = arith.constant 0 : index
    %c0_3 = arith.constant 0 : index
    %4 = vector.load %arg4[%c0_2, %c0_3] : memref<16x32xf32, #tpu.memory_space<vmem>>, vector<16x32xf32>
    %c0_4 = arith.constant 0 : index
    %c0_5 = arith.constant 0 : index
    %c0_6 = arith.constant 0 : index
    %5 = vector.load %arg5[%c0_4, %c0_5, %c0_6] : memref<1x32x32xf32, #tpu.memory_space<vmem>>, vector<1x32x32xf32>
    %6 = vector.shape_cast %5 : vector<1x32x32xf32> to vector<32x32xf32>
    %cst = arith.constant dense<0.000000e+00> : vector<16x32xf32>
    %7 = tpu.matmul %4, %6, %cst {dimension_numbers = #tpu.dot_dimension_numbers<[1], [1], [0], [0], [0, 0, 1, 0], [], []>} : vector<16x32xf32>, vector<32x32xf32>, vector<16x32xf32> -> vector<16x32xf32>
    %8 = arith.addf %3, %7 : vector<16x32xf32>
    %c0_7 = arith.constant 0 : index
    %c0_8 = arith.constant 0 : index
    %9 = vector.load %arg7[%c0_7, %c0_8] : memref<16x32xf32, #tpu.memory_space<vmem>>, vector<16x32xf32>
    tpu.vector_store %arg7[%c0_7, %c0_8], %8 {strides = array<i32>} : memref<16x32xf32, #tpu.memory_space<vmem>>, vector<16x32xf32>,
    %c0_i32_9 = arith.constant 0 : i32
    %10 = arith.cmpi eq, %arg3, %c0_i32_9 : i32
    %11 = arith.extui %10 : i1 to i32
    %c0_i32_10 = arith.constant 0 : i32
    %12 = arith.cmpi ne, %11, %c0_i32_10 : i32
    scf.if %12 {
      %c0_11 = arith.constant 0 : index
      %c0_12 = arith.constant 0 : index
      %13 = vector.load %arg7[%c0_11, %c0_12] : memref<16x32xf32, #tpu.memory_space<vmem>>, vector<16x32xf32>
      %c0_13 = arith.constant 0 : index
      %c0_14 = arith.constant 0 : index
      %c0_15 = arith.constant 0 : index
      %14 = vector.load %arg6[%c0_13, %c0_14, %c0_15] : memref<1x16x32xf32, #tpu.memory_space<vmem>>, vector<1x16x32xf32>
      %15 = vector.shape_cast %14 : vector<1x16x32xf32> to vector<16x32xf32>
      %16 = vector.shape_cast %13 : vector<16x32xf32> to vector<1x16x32xf32>
      tpu.vector_store %arg6[%c0_13, %c0_14, %c0_15], %16 {strides = array<i32>} : memref<1x16x32xf32, #tpu.memory_space<vmem>>, vector<1x16x32xf32>,
    } else {
    }
    return
  }
  func.func @transform_0(%arg0: i32, %arg1: i32, %arg2: i32, %arg3: i32) -> (i32, i32) {
    %c0_i32 = arith.constant 0 : i32
    return %arg1, %arg3 : i32, i32
  }
  func.func @transform_1(%arg0: i32, %arg1: i32, %arg2: i32, %arg3: i32) -> (i32, i32, i32) {
    %c0_i32 = arith.constant 0 : i32
    return %arg0, %arg2, %arg3 : i32, i32, i32
  }
  func.func @transform_2(%arg0: i32, %arg1: i32, %arg2: i32, %arg3: i32) -> (i32, i32, i32) {
    %c0_i32 = arith.constant 0 : i32
    return %arg0, %arg1, %arg2 : i32, i32, i32
  }
}

</mosaic_0001>

<bundles_post_ra>
// kernel: tpu_custom_call.1
= control target key start
LH: loop header
LB: loop body
LE: loop exit
PB: predicated region body
PF: predicated region fallthrough
CT: control target
= control target key end

     0   :  { %7 = vsyncpa [#allocation4], 0  ;;  %s876_s0 = inlined_call_operand.hbm [shape: f32[16,32], index: 0, kind: input, shape index: {}]   ;;  %s877_s1 = inlined_call_operand.hbm [shape: f32[3,32,32], index: 1, kind: input, shape index: {}]   ;;  %s878_s2 = inlined_call_operand.hbm [shape: f32[3,16,32], index: 2, kind: output, shape index: {}]  }
   0x1   :  { %8 = vsyncpa [#allocation7], 0 }
   0x2   :  { %10 = vsyncpa [#allocation7 + $0x1], 0 }
   0x3   :  { %11 = vsyncpa [#allocation5], 0 }
   0x4   :  { %13 = vsyncpa [#allocation5 + $0x1], 0  ;;  %s706_s9 = smov 0   ;;  %s708_s10 = smov 0  }
   0x5   :  { %s710_s11 = smov 0   ;;  %s712_s12 = smov 0  }
   0x6   :  { %s714_s13 = smov 0   ;;  %s716_s14 = smov 0  }
   0x7 LB: > { %s430_s15 = sadd.s32 4294967295, %s683_s14   ;;  %s431_s16 = sadd.s32 4294967294, %s683_s14   ;;  %s683_s14 = sphi %s716_s14, %s19_s14   ;;  %s679_s13 = sphi %s714_s13, %s890_s13   ;;  %s675_s12 = sphi %s712_s12, %s889_s12   ;;  %s671_s11 = sphi %s710_s11, %s888_s11   ;;  %s667_s10 = sphi %s708_s10, %s887_s10   ;;  %s663_s9 = sphi %s706_s9, %s886_s9  }
   0x8   : > { %p97_p0 = scmp.ne.s32.totalorder %s667_s10, %s663_s9  ;;  %p740_p1 = scmp.eq.s32.totalorder %s430_s15, 0 }
   0x9   : > { %p744_p2 = scmp.eq.s32.totalorder %s430_s15, 2  ;;  %p131_p3 = scmp.eq.s32.totalorder %s431_s16, 2 }
   0xa   : > { %p750_p4 = por %p740_p1, %p97_p0  ;;  %p432_p5 = scmp.ge.s32.totalorder %s683_s14, 1 }
   0xb   : > { %p755_p6 = por %p131_p3, %p97_p0  ;;  %p138_p7 = scmp.lt.s32.totalorder %s683_s14, 4 }
   0xc   : > { %s153_s23 = sshll.u32 %s876_s0, 4  ;;  %s685_s25 = smov [#allocation3]   ;;  %s154_s23 = int_to_ptr.hbm [resolvable:$true] %s153_s23 }
   0xd   : > { %p763_p8 = pnand %p432_p5, %p138_p7  ;;  %s155_s26 = sshll.u32 %s685_s25, 4  ;;  %s156_s26 = int_to_ptr.vmem [resolvable:$true] %s155_s26 }
   0xe   : > { %s686_s27 = smov 128   ;;  %s687_s28 = smov 8  }
   0xf   : > { %p467_p9 = pneg %p763_p8  ;;  %s45_s29 = sadd.s32 1, %s679_s13 }
  0x10   : > { %p47_p11 = scmp.ge.s32.totalorder %s45_s29, 3  ;;  %s84_s30 = sadd.s32 1, %s671_s11 }
  0x11   : > { %p468_p10 = pnand %p467_p9, %p740_p1  ;;  %p91_p12 = scmp.ne.s32.totalorder %s671_s11, %s667_s10 }
  0x12   : > { %p92_p13 = scmp.eq.s32.totalorder %s683_s14, 0  ;;  %s892_s29 = smov (%p47_p11, %s45_s29), 0 }
  0x13   : > { %470 = dma.hbm_to_vmem [thread:$0]  (!%p468_p10), %s154_s23, 256, %s156_s26, [#allocation4], %s686_s27, %s686_s27, %s687_s28  }
  0x14   : > { %p781_p0 = por %p92_p13, %p91_p12  ;;  %p787_p3 = por %p744_p2, %p91_p12 }
  0x15   : > { %s77_s5 = ssub.s32 %s679_s13, %s892_s29  ;;  %p480_p5 = scmp.lt.s32.totalorder %s683_s14, 3 }
  0x16   : > { %p82_p7 = scmp.eq.s32.totalorder %s77_s5, 0  ;;  %s169_s6 = sand.u32 1, %s671_s11  }
  0x17   : > { %s435_s7 = sshll.u32 %s169_s6, 5  ;;  %s453_s15 = sshll.u32 %s679_s13, 5 }
  0x18   : > { %s796_s8 = scalar_select %p82_p7, %s671_s11, %s84_s30  }
  0x19   : > { %s181_s22 = scalar_lea.hbm %s877_s1, %s453_s15  ;;  %s173_s23 = scalar_lea.vmem [#allocation6], %s435_s7 }
  0x1a   : > { %s184_s25 = sshll.u32 %s173_s23, 4  ;;  %s182_s18 = sshll.u32 %s181_s22, 4  ;;  %s185_s25 = int_to_ptr.vmem [resolvable:$true] %s184_s25  ;;  %s183_s18 = int_to_ptr.hbm [resolvable:$true] %s182_s18 }
  0x1b   : > { %p472_p2 = pnand %p480_p5, %p781_p0  ;;  %s170_s26 = scalar_lea.sflag [#allocation7], %s169_s6 }
  0x1c   : > { %196 = sbr.rel (%p763_p8) target bundleno = 195 (0xc3), region = 28 }
  0x1d   : > { %474 = dma.hbm_to_vmem [thread:$0]  (!%p472_p2), %s183_s18, 512, %s185_s25, %s170_s26, %s686_s27, %s686_s27, %s687_s28  }
  0x21   : > { %650 = dma.done.wait (%p740_p1), [#allocation4], 256  }
  0x22   : > { %652 = vsyncadd (%p740_p1), [#allocation4], 4294967040  ;;  %s814_s30 = sand.u32 1, %s667_s10  }
  0x23   : > { %s440_s3 = sshll.u32 %s814_s30, 5  ;;  %s204_s5 = scalar_lea.sflag [#allocation7], %s814_s30 }
  0x24   : > { %s207_s6 = scalar_lea.vmem [#allocation6], %s440_s3 }
  0x25   : > { %654 = dma.done.wait (%p750_p4), %s204_s5, 512  }
  0x26   : > { %656 = vsyncadd (%p750_p4), %s204_s5, 4294966784  ;;  %vm236_vm0 = vcmask 261120   ;;  %v688_v0 = vmov 0.0   ;;  %v246_v1 = vld [vmem:[%s207_s6 + $0x18] sm:$0xff]  ;;  %v245_v2 = vld [vmem:[%s207_s6 + $0x10] sm:$0xff]  ;;  %s441_s17 = sshll.u32 %s814_s30, 4 }
  0x27   : > { %237 = vst.msk [vmem:[#allocation2] sm:$0xff] %vm236_vm0, %v688_v0  ;;  %442 = vmatpush.xpose.msk.msra.mxu0 %vm236_vm0, %v246_v1  ;;  %455 = vmatpush.xpose.msk.msra.mxu1 %vm236_vm0, %v246_v1  ;;  %v244_v3 = vld [vmem:[%s207_s6 + $0x8] sm:$0xff]  ;;  %v243_v4 = vld [vmem:[%s207_s6] sm:$0xff]  ;;  %v241_v5 = vld [vmem:[#allocation3] sm:$0xff]  ;;  %s454_s19 = sshll.u32 %s675_s12, 4  ;;  %s228_s7 = scalar_lea.vmem [#allocation8], %s441_s17 }
  0x28   : > { %238 = vst.msk [vmem:[#allocation2 + $0x8] sm:$0xff] %vm236_vm0, %v688_v0  ;;  %v242_v6 = vld [vmem:[#allocation3 + $0x8] sm:$0xff]  ;;  %s315_s28 = scalar_lea.hbm %s878_s2, %s454_s19  ;;  %s316_s15 = sshll.u32 %s228_s7, 4  ;;  %s317_s15 = int_to_ptr.vmem [resolvable:$true] %s316_s15 }
  0x29   : > { %s318_s16 = sshll.u32 %s315_s28, 4  ;;  %s301_s12 = scalar_lea.sflag [#allocation5], %s814_s30  ;;  %s319_s16 = int_to_ptr.hbm [resolvable:$true] %s318_s16 }
  0x2a   : > { %s611_s21 = sshra.s32 %s319_s16, 4  ;;  %s617_s18 = scalar_lea.hbm %s878_s2, 48  ;;  %s612_s21 = int_to_ptr.hbm [resolvable:$true] %s611_s21 }
  0x2b   : > { %443 = vmatpush.xpose.msk.msra.mxu0 %vm236_vm0, %v245_v2  ;;  %456 = vmatpush.xpose.msk.msra.mxu1 %vm236_vm0, %v245_v2  ;;  %s613_s22 = scalar_lea.hbm %s612_s21, 16  ;;  %p618_p9 = scmp.lt.s32.totalorder %s612_s21, %s878_s2 }
  0x2c   : > { %p614_p1 = scmp.ne.s32.totalorder %s612_s21, %s613_s22  ;;  %p619_p10 = scmp.lt.s32.totalorder %s617_s18, %s613_s22 }
  0x2e   : > { %v239_v7 = vld [vmem:[#allocation2] sm:$0xff]  ;;  %p615_p4 = pnand %p614_p1, %p787_p3  ;;  %p620_p11 = por %p619_p10, %p618_p9 }
  0x2f   : > { %444 = vmatpush.xpose.msk.msra.mxu0 %vm236_vm0, %v244_v3  ;;  %457 = vmatpush.xpose.msk.msra.mxu1 %vm236_vm0, %v244_v3  ;;  %v240_v8 = vld [vmem:[#allocation2 + $0x8] sm:$0xff] }
  0x30   : > { %p616_p8 = pneg %p615_p4 }
  0x32   : > { %p621_p12 = pnand %p620_p11, %p616_p8 }
  0x33   : > { %445 = vmatpush.xpose.msk.msra.mxu0 %vm236_vm0, %v243_v4  ;;  %458 = vmatpush.xpose.msk.msra.mxu1 %vm236_vm0, %v243_v4 }
  0x36   : > { %446 = vmatmul.msk.f32.vlgmr.msra.gmra.mxu0 %vm236_vm0, %v241_v5  ;;  %447 = vmatmul.msk.f32.vlgmr.msra.gmra.mxu1 %vm236_vm0, %v242_v6 }
  0xb3   : > { %v283_v9 = vpop.f32.mrf.mxu0  ;;  %v286_v10 = vpop.f32.mrf.mxu1 }
  0xb4   : > { %v289_v11 = vadd.f32 %v283_v9, %v239_v7  ;;  %v290_v12 = vadd.f32 %v286_v10, %v240_v8 }
  0xb6   : > { %291 = vst.msk [vmem:[#allocation2] sm:$0xff] %vm236_vm0, %v289_v11 }
  0xb7   : > { %292 = vst.msk [vmem:[#allocation2 + $0x8] sm:$0xff] %vm236_vm0, %v290_v12 }
  0xbd   : > { %v296_v13 = vld [vmem:[#allocation2] sm:$0xff] }
  0xbe   : > { %v297_v14 = vld [vmem:[#allocation2 + $0x8] sm:$0xff]  ;;  %298 = vst.msk [vmem:[%s228_s7] sm:$0xff] %vm236_vm0, %v296_v13 }
  0xbf   : > { %299 = vst.msk [vmem:[%s228_s7 + $0x8] sm:$0xff] %vm236_vm0, %v297_v14 }
  0xc0   : > { %624 = shalt.err (!%p621_p12)
}
  0xc1   : > { %s689_s30 = smov 128   ;;  %s690_s5 = smov 8  }
  0xc2   : > { %465 = dma.vmem_to_hbm [thread:$0]  (%p787_p3), %s317_s15, 256, %s319_s16, %s301_s12, %s689_s30, %s689_s30, %s690_s5  }
  0xc3 PF: > { %p482_p13 = scmp.ge.s32.totalorder %s683_s14, 2  ;;  %s333_s6 = sand.u32 1, %s663_s9  }
  0xc4   : > { %s334_s17 = scalar_lea.sflag [#allocation5], %s333_s6 }
  0xc5   : > { %p476_p0 = pnand %p482_p13, %p755_p6 }
  0xc7   : > { %p477_p5 = pneg %p476_p0 }
  0xc9   : > { %658 = dma.done.wait (%p477_p5), %s334_s17, 256  }
  0xca   : > { %660 = vsyncadd (%p477_p5), %s334_s17, 4294967040  ;;  %s19_s14 = sadd.s32 1, %s683_s14   ;;  %s886_s9 = smov %s667_s10 }
  0xcb   : > { %p16_p7 = scmp.ge.s32.totalorder %s19_s14, 5   ;;  %s887_s10 = smov %s671_s11 }
  0xcc   : > { %s888_s11 = smov %s796_s8  ;;  %s889_s12 = smov %s679_s13 }
  0xcd   : > { %s890_s13 = smov %s892_s29  ;;  %18 = sbr.rel (!%p16_p7) target bundleno = 7 (0x7), region = 87 }
  0xd2   :  { %340 = vsyncpa [#allocation4], 1 }
  0xd3   :  { %342 = vsyncpa [#allocation4 + $0x1], 1 }
  0xd4   :  { %343 = vsyncpa [#allocation7], 1 }
  0xd5   :  { %345 = vsyncpa [#allocation7 + $0x1], 1 }
  0xd6   :  { %346 = vsyncpa [#allocation5], 1 }
  0xd7   :  { %348 = vsyncpa [#allocation5 + $0x1], 1 }

</bundles_post_ra>
